<compile_context>
chip_gen: v6e
topology: v6e:2x2x1
jax: 0.10.0
libtpu: 0.0.40
codegen_flags: <defaults>
</compile_context>

<pallas_src>
import jax
import jax.numpy as jnp
from jax.experimental import pallas as pl
from jax.experimental.pallas import tpu as pltpu


# ----------------------------- configuration --------------------------------
CONTEXT_FEATURES = ("user_id", "device", "hour", "region")       # F = 4
VOCAB_SIZES      = (50, 30, 24, 10)                              # per-feature vocab
EMBEDDING_DIM    = 32                                            # E
MLP_LAYERS       = (64, 32)                                      # hidden sizes
NUM_FEATURES     = len(CONTEXT_FEATURES)
TOTAL_EMB_DIM    = NUM_FEATURES * EMBEDDING_DIM                  # D = 128
VOCAB_OFFSETS    = tuple(int(sum(VOCAB_SIZES[:f])) for f in range(NUM_FEATURES))
TOTAL_VOCAB      = int(sum(VOCAB_SIZES))                         # 114
V_PAD            = 128                                           # lane-pad vocab axis
H2_PAD           = 128                                           # lane-pad output axis
BATCH            = 8


def _round_up(x, m):
    return ((x + m - 1) // m) * m


# ------------------------------- Pallas kernel -------------------------------
def _encoder_kernel(ids_ref, tbl_ref, w1_ref, b1_ref, w2_ref, b2_ref, out_ref):
    """Fused: one-hot embedding-gather matmul -> Linear -> ReLU -> Linear."""
    ids = ids_ref[...]                                           # (TB, F) int32
    tb = ids.shape[0]

    # Build the multi-hot selection matrix (TB, V_PAD) from the int32 ids.
    lane = jax.lax.broadcasted_iota(jnp.int32, (tb, V_PAD), 1)
    multihot = jnp.zeros((tb, V_PAD), jnp.float32)
    for f in range(NUM_FEATURES):                                # static unroll (F=4)
        tgt = ids[:, f:f + 1] + VOCAB_OFFSETS[f]                 # (TB, 1)
        multihot = multihot + (lane == tgt).astype(jnp.float32)

    # Embedding gather + concat == multihot @ block-diagonal stacked table.
    emb = jnp.dot(multihot.astype(jnp.bfloat16), tbl_ref[...],
                  preferred_element_type=jnp.float32)            # (TB, D) f32

    # MLP: Linear -> ReLU -> Linear (bf16 MXU operands, f32 accumulate/elementwise).
    h = jnp.dot(emb.astype(jnp.bfloat16), w1_ref[...],
                preferred_element_type=jnp.float32) + b1_ref[...]
    h = jnp.maximum(h, 0.0)                                      # ReLU (f32 VPU)
    y = jnp.dot(h.astype(jnp.bfloat16), w2_ref[...],
                preferred_element_type=jnp.float32) + b2_ref[...]
    out_ref[...] = y.astype(out_ref.dtype)                       # (TB, 128) lane-dense


@jax.jit
def mlp_query_encoder_forward(feature_ids, big_table, w1, b1, w2, b2):
    """feature_ids: int32 (B, F).  w2/b2 are column-padded to H2_PAD.

    Returns (B, MLP_LAYERS[-1]) f32.
    """
    B = feature_ids.shape[0]
    H1 = w1.shape[1]
    H2p = w2.shape[1]                                            # padded (128)

    TB = min(512, _round_up(B, 8))           # big tiles once B grows; TB=B at B=8
    B_pad = _round_up(B, TB)
    if B_pad != B:
        feature_ids = jnp.pad(feature_ids, ((0, B_pad - B), (0, 0)))
    n_blocks = B_pad // TB

    grid_spec = pltpu.PrefetchScalarGridSpec(
        num_scalar_prefetch=0,
        grid=(n_blocks,),
        in_specs=[
            pl.BlockSpec((TB, NUM_FEATURES), lambda i: (i, 0)),          # ids tile
            pl.BlockSpec((V_PAD, TOTAL_EMB_DIM), lambda i: (0, 0)),      # table (resident)
            pl.BlockSpec((TOTAL_EMB_DIM, H1), lambda i: (0, 0)),         # w1 (resident)
            pl.BlockSpec((1, H1), lambda i: (0, 0)),                     # b1 (resident)
            pl.BlockSpec((H1, H2p), lambda i: (0, 0)),                   # w2 (resident)
            pl.BlockSpec((1, H2p), lambda i: (0, 0)),                    # b2 (resident)
        ],
        out_specs=pl.BlockSpec((TB, H2p), lambda i: (i, 0)),
    )
    out = pl.pallas_call(
        _encoder_kernel,
        out_shape=jax.ShapeDtypeStruct((B_pad, H2p), jnp.float32),
        grid_spec=grid_spec,
        compiler_params=pltpu.CompilerParams(
            dimension_semantics=("parallel",)),
    )(feature_ids, big_table, w1, b1, w2, b2)
    return out[:B, :MLP_LAYERS[-1]]


# ------------------------------ parameters -----------------------------------
def init_params(key):
    """Deterministic parameter init (embedding tables + 2 Linear layers)."""
    keys = jax.random.split(key, NUM_FEATURES + 4)
    tables = [
        jax.random.normal(keys[i], (VOCAB_SIZES[i], EMBEDDING_DIM), jnp.float32) * 0.02
        for i in range(NUM_FEATURES)
    ]
    d_in, h1, h2 = TOTAL_EMB_DIM, MLP_LAYERS[0], MLP_LAYERS[1]
    k = NUM_FEATURES
    lim1 = 1.0 / float(d_in) ** 0.5
    lim2 = 1.0 / float(h1) ** 0.5
    w1 = jax.random.uniform(keys[k + 0], (d_in, h1), jnp.float32, -lim1, lim1)
    b1 = jax.random.uniform(keys[k + 1], (1, h1), jnp.float32, -lim1, lim1)
    w2 = jax.random.uniform(keys[k + 2], (h1, h2), jnp.float32, -lim2, lim2)
    b2 = jax.random.uniform(keys[k + 3], (1, h2), jnp.float32, -lim2, lim2)
    return tables, (w1, b1, w2, b2)


def pack_params(tables, mlp_params):
    """One-time transform: block-diagonal stacked table, bf16 matmul weights,
    and zero-padding of W2/b2 output columns to 128 lanes (lane-dense store)."""
    big = jnp.zeros((V_PAD, TOTAL_EMB_DIM), jnp.float32)
    for f in range(NUM_FEATURES):
        off = VOCAB_OFFSETS[f]
        big = big.at[off:off + VOCAB_SIZES[f],
                     f * EMBEDDING_DIM:(f + 1) * EMBEDDING_DIM].set(tables[f])
    w1, b1, w2, b2 = mlp_params
    h2 = w2.shape[1]
    w2p = jnp.pad(w2, ((0, 0), (0, H2_PAD - h2)))
    b2p = jnp.pad(b2, ((0, 0), (0, H2_PAD - h2)))
    return (big.astype(jnp.bfloat16),
            w1.astype(jnp.bfloat16), b1,
            w2p.astype(jnp.bfloat16), b2p)


# --------------------------------- driver ------------------------------------
if __name__ == "__main__":
    key = jax.random.PRNGKey(0)
    k_ids, k_params = jax.random.split(key)

    # Deterministic int feature ids, one column per context feature.
    id_keys = jax.random.split(k_ids, NUM_FEATURES)
    cols = [jax.random.randint(id_keys[f], (BATCH, 1), 0, VOCAB_SIZES[f], jnp.int32)
            for f in range(NUM_FEATURES)]
    feature_ids = jnp.concatenate(cols, axis=1)                  # (B, F) int32

    tables, mlp_params = init_params(k_params)
    big_table, w1p, b1p, w2p, b2p = pack_params(tables, mlp_params)

    out = mlp_query_encoder_forward(feature_ids, big_table, w1p, b1p, w2p, b2p)
    out = jax.block_until_ready(out)

    # Pure-JAX reference mirroring the kernel math (bf16 operands, f32 accumulate),
    # built from the ORIGINAL (unpadded) parameters.
    def bf16(x):
        return x.astype(jnp.bfloat16).astype(jnp.float32)

    w1, b1, w2, b2 = mlp_params
    embs = [jnp.take(bf16(tables[f]), feature_ids[:, f], axis=0)
            for f in range(NUM_FEATURES)]
    emb = jnp.concatenate(embs, axis=-1)                         # (B, 128)
    h = jnp.maximum(bf16(emb) @ bf16(w1) + b1, 0.0)
    ref = bf16(h) @ bf16(w2) + b2

    assert out.shape == (BATCH, MLP_LAYERS[-1])
    assert jnp.allclose(out, ref, atol=1e-3, rtol=1e-3), float(jnp.max(jnp.abs(out - ref)))

    print("KERNEL_OK")
</pallas_src>

<mosaic_0001>
module attributes {stable_mosaic.version = 11 : i64} {
  func.func @_encoder_kernel(%arg0: i32, %arg1: memref<8x4xi32, #tpu.memory_space<vmem>>, %arg2: memref<128x128xbf16, #tpu.memory_space<vmem>>, %arg3: memref<128x64xbf16, #tpu.memory_space<vmem>>, %arg4: memref<1x64xf32, #tpu.memory_space<vmem>>, %arg5: memref<64x128xbf16, #tpu.memory_space<vmem>>, %arg6: memref<1x128xf32, #tpu.memory_space<vmem>>, %arg7: memref<8x128xf32, #tpu.memory_space<vmem>>) attributes {dimension_semantics = [#tpu.dimension_semantics<parallel>], iteration_bounds = array<i64: 1>, scalar_prefetch = 0 : i64, scratch_operands = 0 : i64, tpu.core_type = #tpu.core_type<tc>, window_params = [{transform_indices = @transform_0, window_bounds = array<i64: 8, 4>}, {pipeline_mode = #tpu.pipeline_mode<synchronous>, transform_indices = @transform_1, window_bounds = array<i64: 128, 128>}, {pipeline_mode = #tpu.pipeline_mode<synchronous>, transform_indices = @transform_2, window_bounds = array<i64: 128, 64>}, {pipeline_mode = #tpu.pipeline_mode<synchronous>, transform_indices = @transform_3, window_bounds = array<i64: 1, 64>}, {pipeline_mode = #tpu.pipeline_mode<synchronous>, transform_indices = @transform_4, window_bounds = array<i64: 64, 128>}, {pipeline_mode = #tpu.pipeline_mode<synchronous>, transform_indices = @transform_5, window_bounds = array<i64: 1, 128>}, {transform_indices = @transform_6, window_bounds = array<i64: 8, 128>}]} {
    %c0 = arith.constant 0 : index
    %c0_0 = arith.constant 0 : index
    %0 = vector.load %arg1[%c0, %c0_0] : memref<8x4xi32, #tpu.memory_space<vmem>>, vector<8x4xi32>
    %1 = tpu.iota {dimensions = array<i32: 1>} : vector<8x128xi32>
    %cst = arith.constant 0.000000e+00 : f32
    %2 = vector.broadcast %cst : f32 to vector<8x128xf32>
    %3 = vector.extract_strided_slice %0 {offsets = [0, 0], sizes = [8, 1], strides = [1, 1]} : vector<8x4xi32> to vector<8x1xi32>
    %c0_i32 = arith.constant 0 : i32
    %4 = vector.broadcast %c0_i32 : i32 to vector<8x1xi32>
    %5 = arith.addi %3, %4 : vector<8x1xi32>
    %6 = vector.broadcast %5 : vector<8x1xi32> to vector<8x128xi32>
    %7 = arith.cmpi eq, %1, %6 : vector<8x128xi32>
    %8 = arith.extui %7 : vector<8x128xi1> to vector<8x128xi32>
    %9 = arith.sitofp %8 : vector<8x128xi32> to vector<8x128xf32>
    %10 = arith.addf %2, %9 : vector<8x128xf32>
    %11 = vector.extract_strided_slice %0 {offsets = [0, 1], sizes = [8, 1], strides = [1, 1]} : vector<8x4xi32> to vector<8x1xi32>
    %c50_i32 = arith.constant 50 : i32
    %12 = vector.broadcast %c50_i32 : i32 to vector<8x1xi32>
    %13 = arith.addi %11, %12 : vector<8x1xi32>
    %14 = vector.broadcast %13 : vector<8x1xi32> to vector<8x128xi32>
    %15 = arith.cmpi eq, %1, %14 : vector<8x128xi32>
    %16 = arith.extui %15 : vector<8x128xi1> to vector<8x128xi32>
    %17 = arith.sitofp %16 : vector<8x128xi32> to vector<8x128xf32>
    %18 = arith.addf %10, %17 : vector<8x128xf32>
    %19 = vector.extract_strided_slice %0 {offsets = [0, 2], sizes = [8, 1], strides = [1, 1]} : vector<8x4xi32> to vector<8x1xi32>
    %c80_i32 = arith.constant 80 : i32
    %20 = vector.broadcast %c80_i32 : i32 to vector<8x1xi32>
    %21 = arith.addi %19, %20 : vector<8x1xi32>
    %22 = vector.broadcast %21 : vector<8x1xi32> to vector<8x128xi32>
    %23 = arith.cmpi eq, %1, %22 : vector<8x128xi32>
    %24 = arith.extui %23 : vector<8x128xi1> to vector<8x128xi32>
    %25 = arith.sitofp %24 : vector<8x128xi32> to vector<8x128xf32>
    %26 = arith.addf %18, %25 : vector<8x128xf32>
    %27 = vector.extract_strided_slice %0 {offsets = [0, 3], sizes = [8, 1], strides = [1, 1]} : vector<8x4xi32> to vector<8x1xi32>
    %c104_i32 = arith.constant 104 : i32
    %28 = vector.broadcast %c104_i32 : i32 to vector<8x1xi32>
    %29 = arith.addi %27, %28 : vector<8x1xi32>
    %30 = vector.broadcast %29 : vector<8x1xi32> to vector<8x128xi32>
    %31 = arith.cmpi eq, %1, %30 : vector<8x128xi32>
    %32 = arith.extui %31 : vector<8x128xi1> to vector<8x128xi32>
    %33 = arith.sitofp %32 : vector<8x128xi32> to vector<8x128xf32>
    %34 = arith.addf %26, %33 : vector<8x128xf32>
    %35 = arith.truncf %34 : vector<8x128xf32> to vector<8x128xbf16>
    %c0_1 = arith.constant 0 : index
    %c0_2 = arith.constant 0 : index
    %36 = vector.load %arg2[%c0_1, %c0_2] : memref<128x128xbf16, #tpu.memory_space<vmem>>, vector<128x128xbf16>
    %cst_3 = arith.constant dense<0.000000e+00> : vector<8x128xf32>
    %37 = tpu.matmul %35, %36, %cst_3 {dimension_numbers = #tpu.dot_dimension_numbers<[1], [0], [0], [1], [0, 0, 1, 1], [], []>} : vector<8x128xbf16>, vector<128x128xbf16>, vector<8x128xf32> -> vector<8x128xf32>
    %38 = arith.truncf %37 : vector<8x128xf32> to vector<8x128xbf16>
    %c0_4 = arith.constant 0 : index
    %c0_5 = arith.constant 0 : index
    %39 = vector.load %arg3[%c0_4, %c0_5] : memref<128x64xbf16, #tpu.memory_space<vmem>>, vector<128x64xbf16>
    %cst_6 = arith.constant dense<0.000000e+00> : vector<8x64xf32>
    %40 = tpu.matmul %38, %39, %cst_6 {dimension_numbers = #tpu.dot_dimension_numbers<[1], [0], [0], [1], [0, 0, 1, 1], [], []>} : vector<8x128xbf16>, vector<128x64xbf16>, vector<8x64xf32> -> vector<8x64xf32>
    %c0_7 = arith.constant 0 : index
    %c0_8 = arith.constant 0 : index
    %41 = vector.load %arg4[%c0_7, %c0_8] : memref<1x64xf32, #tpu.memory_space<vmem>>, vector<1x64xf32>
    %42 = vector.broadcast %41 : vector<1x64xf32> to vector<8x64xf32>
    %43 = arith.addf %40, %42 : vector<8x64xf32>
    %cst_9 = arith.constant 0.000000e+00 : f32
    %44 = vector.broadcast %cst_9 : f32 to vector<8x64xf32>
    %45 = arith.maximumf %43, %44 : vector<8x64xf32>
    %46 = arith.truncf %45 : vector<8x64xf32> to vector<8x64xbf16>
    %c0_10 = arith.constant 0 : index
    %c0_11 = arith.constant 0 : index
    %47 = vector.load %arg5[%c0_10, %c0_11] : memref<64x128xbf16, #tpu.memory_space<vmem>>, vector<64x128xbf16>
    %cst_12 = arith.constant dense<0.000000e+00> : vector<8x128xf32>
    %48 = tpu.matmul %46, %47, %cst_12 {dimension_numbers = #tpu.dot_dimension_numbers<[1], [0], [0], [1], [0, 0, 1, 1], [], []>} : vector<8x64xbf16>, vector<64x128xbf16>, vector<8x128xf32> -> vector<8x128xf32>
    %c0_13 = arith.constant 0 : index
    %c0_14 = arith.constant 0 : index
    %49 = vector.load %arg6[%c0_13, %c0_14] : memref<1x128xf32, #tpu.memory_space<vmem>>, vector<1x128xf32>
    %50 = vector.broadcast %49 : vector<1x128xf32> to vector<8x128xf32>
    %51 = arith.addf %48, %50 : vector<8x128xf32>
    %c0_15 = arith.constant 0 : index
    %c0_16 = arith.constant 0 : index
    %52 = vector.load %arg7[%c0_15, %c0_16] : memref<8x128xf32, #tpu.memory_space<vmem>>, vector<8x128xf32>
    tpu.vector_store %arg7[%c0_15, %c0_16], %51 {strides = array<i32>} : memref<8x128xf32, #tpu.memory_space<vmem>>, vector<8x128xf32>,
    return
  }
  func.func @transform_0(%arg0: i32) -> (i32, i32) {
    %c0_i32 = arith.constant 0 : i32
    %c0_i32_0 = arith.constant 0 : i32
    return %arg0, %c0_i32 : i32, i32
  }
  func.func @transform_1(%arg0: i32) -> (i32, i32) {
    %c0_i32 = arith.constant 0 : i32
    %c0_i32_0 = arith.constant 0 : i32
    %c0_i32_1 = arith.constant 0 : i32
    return %c0_i32, %c0_i32_0 : i32, i32
  }
  func.func @transform_2(%arg0: i32) -> (i32, i32) {
    %c0_i32 = arith.constant 0 : i32
    %c0_i32_0 = arith.constant 0 : i32
    %c0_i32_1 = arith.constant 0 : i32
    return %c0_i32, %c0_i32_0 : i32, i32
  }
  func.func @transform_3(%arg0: i32) -> (i32, i32) {
    %c0_i32 = arith.constant 0 : i32
    %c0_i32_0 = arith.constant 0 : i32
    %c0_i32_1 = arith.constant 0 : i32
    return %c0_i32, %c0_i32_0 : i32, i32
  }
  func.func @transform_4(%arg0: i32) -> (i32, i32) {
    %c0_i32 = arith.constant 0 : i32
    %c0_i32_0 = arith.constant 0 : i32
    %c0_i32_1 = arith.constant 0 : i32
    return %c0_i32, %c0_i32_0 : i32, i32
  }
  func.func @transform_5(%arg0: i32) -> (i32, i32) {
    %c0_i32 = arith.constant 0 : i32
    %c0_i32_0 = arith.constant 0 : i32
    %c0_i32_1 = arith.constant 0 : i32
    return %c0_i32, %c0_i32_0 : i32, i32
  }
  func.func @transform_6(%arg0: i32) -> (i32, i32) {
    %c0_i32 = arith.constant 0 : i32
    %c0_i32_0 = arith.constant 0 : i32
    return %arg0, %c0_i32 : i32, i32
  }
}

</mosaic_0001>

<bundles_post_ra>
// kernel: mlp_query_encoder_forward.1
= control target key start
LH: loop header
LB: loop body
LE: loop exit
PB: predicated region body
PF: predicated region fallthrough
CT: control target
= control target key end

     0   :  { %v532_v2 = vmov 0   ;;  %v533_v3 = vmov 2   ;;  %v534_v5 = vmov 0.0   ;;  %v535_v9 = vmov 1   ;;  %s676_s0 = inlined_call_operand.vmem [shape: s32[8,4], index: 0, kind: input, shape index: {}]   ;;  %s677_s1 = inlined_call_operand.vmem [shape: bf16[128,128], index: 1, kind: input, shape index: {}]   ;;  %s678_s2 = inlined_call_operand.vmem [shape: bf16[128,64], index: 2, kind: input, shape index: {}]   ;;  %s679_s3 = inlined_call_operand.vmem [shape: f32[1,64], index: 3, kind: input, shape index: {}]   ;;  %s680_s4 = inlined_call_operand.vmem [shape: bf16[64,128], index: 4, kind: input, shape index: {}]   ;;  %s681_s5 = inlined_call_operand.vmem [shape: f32[1,128], index: 5, kind: input, shape index: {}]   ;;  %s682_s6 = inlined_call_operand.hbm [shape: f32[8,128], index: 6, kind: output, shape index: {}]  }
   0x1   :  { %v25_v0 = vld [vmem:[%s676_s0] sm:$0xff]  ;;  %v490_v1 = vld [vmem:[%s677_s1 + $0x38] sm:$0xff]   ;;  %485 = vset.pattern.permute.xlu0 %v532_v2  ;;  %487 = vset.pattern.permute.xlu1 %v533_v3  ;;  %v491_v8 = vld [vmem:[%s677_s1 + $0x30] sm:$0xff]   ;;  %v536_v10 = vmov 3   ;;  %vm537_vm0 = vmmov 0  }
   0x2   :  { %v43_v4 = vadd.s32 80, %v25_v0  ;;  %29 = vperm.xlu0 %485, %v25_v0   ;;  %426 = vmatprep.subr.bf16.mxu0 %v534_v5  ;;  %v35_v6 = vadd.s32 50, %v25_v0  ;;  %v51_v7 = vadd.s32 104, %v25_v0  ;;  %v492_v11 = vld [vmem:[%s677_s1 + $0x28] sm:$0xff]   ;;  %v493_v12 = vld [vmem:[%s677_s1 + $0x20] sm:$0xff]   ;;  %v498_v13 = vld [vmem:[%s678_s2 + $0x38] sm:$0xff]  }
   0x3   :  { %427 = vmatpush3.bf16.msra.mxu0 %v490_v1  ;;  %446 = vmatprep.subr.bf16.mxu1 %v534_v5  ;;  %v499_v14 = vld [vmem:[%s678_s2 + $0x30] sm:$0xff]   ;;  %v494_v15 = vld [vmem:[%s677_s1 + $0x18] sm:$0xff]   ;;  %v500_v16 = vld [vmem:[%s678_s2 + $0x28] sm:$0xff]  }
   0x4   :  { %45 = vperm.xlu1 %487, %v43_v4   ;;  %428 = vmatprep.subr.bf16.mxu0 %v534_v5  ;;  %v495_v17 = vld [vmem:[%s677_s1 + $0x10] sm:$0xff]  }
   0x5   :  { %442 = vmatprep.mubr.msk.bf16.mxu0 %vm537_vm0, %v534_v5  ;;  %462 = vmatprep.mubr.msk.bf16.mxu1 %vm537_vm0, %v534_v5 }
   0x6   :  { %486 = vset.pattern.permute.xlu0 %v535_v9  ;;  %447 = vmatpush3.bf16.msra.mxu1 %v498_v13 }
   0x7   :  { %37 = vperm.xlu0 %486, %v35_v6   ;;  %429 = vmatpush3.bf16.msra.mxu0 %v491_v8 }
   0x8   :  { %488 = vset.pattern.permute.xlu1 %v536_v10  ;;  %430 = vmatprep.subr.bf16.mxu0 %v534_v5 }
   0x9   :  { %53 = vperm.xlu1 %488, %v51_v7   ;;  %448 = vmatprep.subr.bf16.mxu1 %v534_v5 }
   0xa   :  { %449 = vmatpush3.bf16.msra.mxu1 %v499_v14 }
   0xb   :  { %489 = vset.pattern.permute.xlu0 %v536_v10  ;;  %431 = vmatpush3.bf16.msra.mxu0 %v492_v11 }
   0xc   :  { %432 = vmatprep.subr.bf16.mxu0 %v534_v5  ;;  %450 = vmatprep.subr.bf16.mxu1 %v534_v5 }
   0xf   :  { %433 = vmatpush3.bf16.msra.mxu0 %v493_v12 }
  0x10   :  { %434 = vmatprep.subr.bf16.mxu0 %v534_v5 }
  0x13   :  { %435 = vmatpush3.bf16.msra.mxu0 %v494_v15 }
  0x14   :  { %11 = vsyncpa [#allocation3], 0  ;;  %436 = vmatprep.subr.bf16.mxu0 %v534_v5  ;;  %451 = vmatpush3.bf16.msra.mxu1 %v500_v16  ;;  %v501_v18 = vld [vmem:[%s678_s2 + $0x20] sm:$0xff]   ;;  %v496_v19 = vld [vmem:[%s677_s1 + $0x8] sm:$0xff]   ;;  %v26_v24 = vlaneseq  ;;  %vm317_vm5 = vcmask 523264   ;;  %s538_s15 = smov [#allocation2]  }
  0x15   :  { %452 = vmatprep.subr.bf16.mxu1 %v534_v5  ;;  %v502_v20 = vld [vmem:[%s678_s2 + $0x18] sm:$0xff]   ;;  %v497_v21 = vld [vmem:[%s677_s1] sm:$0xff]   ;;  %v503_v22 = vld [vmem:[%s678_s2 + $0x10] sm:$0xff]  }
  0x16   :  { %v504_v23 = vld [vmem:[%s678_s2 + $0x8] sm:$0xff]   ;;  %v27_v25 = vand.u32 127, %v26_v24  ;;  %v505_v38 = vld [vmem:[%s678_s2] sm:$0xff]   ;;  %v506_v39 = vld [vmem:[%s680_s4 + $0x18] sm:$0xff]  }
  0x17   :  { %437 = vmatpush3.bf16.msra.mxu0 %v495_v17  ;;  %v507_v40 = vld [vmem:[%s680_s4 + $0x10] sm:$0xff]   ;;  %v508_v46 = vld [vmem:[%s680_s4 + $0x8] sm:$0xff]   ;;  %v509_v47 = vld [vmem:[%s680_s4] sm:$0xff]   ;;  %s368_s4 = sshll.u32 %s538_s15, 4  ;;  %s369_s4 = int_to_ptr.vmem [resolvable:$true] %s368_s4 }
  0x18   :  { %438 = vmatprep.subr.bf16.mxu0 %v534_v5  ;;  %453 = vmatpush3.bf16.msra.mxu1 %v501_v18  ;;  %v388_v48 = vld [vmem:[%s679_s3] ss:$0 sm:$0xff]  ;;  %s510_s3 = scalar_lea.vmem %s369_s4, 128  ;;  %p515_p1 = scmp.lt.s32.totalorder %s369_s4, %s369_s4 }
  0x19   :  { %454 = vmatprep.subr.bf16.mxu1 %v534_v5  ;;  %v397_v56 = vld [vmem:[%s681_s5] ss:$0 sm:$0xff]  ;;  %p511_p0 = scmp.ne.s32.totalorder %s369_s4, %s510_s3  ;;  %p516_p2 = scmp.lt.s32.totalorder %s510_s3, %s510_s3 }
  0x1b   :  { %439 = vmatpush3.bf16.msra.mxu0 %v496_v19  ;;  %p517_p3 = por %p516_p2, %p515_p1 }
  0x1c   :  { %440 = vmatprep.subr.bf16.mxu0 %v534_v5  ;;  %455 = vmatpush3.bf16.msra.mxu1 %v502_v20 }
  0x1d   :  { %456 = vmatprep.subr.bf16.mxu1 %v534_v5  ;;  %p518_p4 = pnand %p517_p3, %p511_p0 }
  0x1f   :  { %441 = vmatpush3.bf16.msra.mxu0 %v497_v21 }
  0x20   :  { %466 = vmatprep.subr.bf16.mxu0 %v534_v5  ;;  %457 = vmatpush3.bf16.msra.mxu1 %v503_v22 }
  0x21   :  { %458 = vmatprep.subr.bf16.mxu1 %v534_v5 }
  0x24   :  { %459 = vmatpush3.bf16.msra.mxu1 %v504_v23 }
  0x25   :  { %460 = vmatprep.subr.bf16.mxu1 %v534_v5 }
  0x28   :  { %461 = vmatpush3.bf16.msra.mxu1 %v505_v38 }
  0x7d   :  { %v30_v26 = vpop.permute.xlu0 %29 }
  0x7e   :  { %vm31_vm1 = vcmp.eq.s32.totalorder %v27_v25, %v30_v26 }
  0x7f   :  { %v46_v27 = vpop.permute.xlu1 %45  ;;  %v376_v30 = vsel %vm31_vm1, 1.0, %v534_v5 }
  0x80   :  { %vm47_vm2 = vcmp.eq.s32.totalorder %v27_v25, %v46_v27 }
  0x81   :  { %v378_v33 = vsel %vm47_vm2, 1.0, %v534_v5 }
  0x82   :  { %v38_v28 = vpop.permute.xlu0 %37 }
  0x83   :  { %vm39_vm3 = vcmp.eq.s32.totalorder %v27_v25, %v38_v28 }
  0x84   :  { %v54_v29 = vpop.permute.xlu1 %53  ;;  %v377_v31 = vsel %vm39_vm3, 1.0, %v534_v5 }
  0x85   :  { %vm55_vm4 = vcmp.eq.s32.totalorder %v27_v25, %v54_v29  ;;  %v42_v32 = vadd.f32 %v377_v31, %v376_v30 }
  0x86   :  { %v379_v34 = vsel %vm55_vm4, 1.0, %v534_v5 }
  0x87   :  { %v50_v35 = vadd.f32 %v378_v33, %v42_v32 }
  0x89   :  { %v58_v36 = vadd.f32 %v379_v34, %v50_v35 }
  0x8b   :  { %v59_v37 = vpack.c.bf16 %v58_v36, %v58_v36 }
  0x8d   :  { %443 = vmatmul.mubr.bf16.vlgmr.msra.gmra.mxu0 %v59_v37 }
  0x8e   :  { %474 = vmatprep.mubr.msk.bf16.mxu0 %vm537_vm0, %v534_v5  ;;  %467 = vmatpush3.bf16.msra.mxu0 %v506_v39 }
  0x8f   :  { %468 = vmatprep.subr.bf16.mxu0 %v534_v5 }
  0x92   :  { %469 = vmatpush3.bf16.msra.mxu0 %v507_v40 }
  0x93   :  { %470 = vmatprep.subr.bf16.mxu0 %v534_v5 }
  0x96   :  { %471 = vmatpush3.bf16.msra.mxu0 %v508_v46 }
  0x97   :  { %472 = vmatprep.subr.bf16.mxu0 %v534_v5 }
  0x9a   :  { %473 = vmatpush3.bf16.msra.mxu0 %v509_v47 }
 0x14d   :  { %v158_v41 = vpop.f32.mrf.mxu0 }
 0x14e   :  { %v164_v42 = vpack.c.bf16 %v158_v41, %v158_v41 }
 0x14f   :  { %v444_v43 = vpop.f32.mrf.mxu0 }
 0x150   :  { %463 = vmatmul.mubr.bf16.vlgmr.msra.gmra.mxu1 %v164_v42 }
 0x151   :  { %v161_v44 = vpop.f32.mrf.mxu0 }
 0x153   :  { %v445_v45 = vpop.f32.mrf.mxu0 }
 0x210   :  { %v270_v49 = vpop.f32.mrf.mxu1 }
 0x211   :  { %v271_v50 = vadd.f32 %v388_v48, %v270_v49 }
 0x212   :  { %v464_v51 = vpop.f32.mrf.mxu1 }
 0x213   :  { %v276_v52 = vmax.f32 %v271_v50, 0.0 }
 0x214   :  { %v273_v53 = vpop.f32.mrf.mxu1 }
 0x215   :  { %v277_v54 = vpack.c.bf16 %v276_v52, %v276_v52 }
 0x216   :  { %v465_v55 = vpop.f32.mrf.mxu1 }
 0x217   :  { %475 = vmatmul.mubr.msk.bf16.vlgmr.msra.gmra.mxu0 %vm317_vm5, %v277_v54 }
 0x2d7   :  { %v355_v57 = vpop.f32.mrf.mxu0 }
 0x2d8   :  { %v356_v58 = vadd.f32 %v397_v56, %v355_v57 }
 0x2d9   :  { %v476_v59 = vpop.f32.mrf.mxu0 }
 0x2da   :  { %361 = vst [vmem:[#allocation2] sm:$0xff] %v356_v58 }
 0x2db   :  { %v358_v60 = vpop.f32.mrf.mxu0 }
 0x2dc   :  { %521 = shalt.err (!%p518_p4)
}
 0x2dd   :  { %371 = dma.vmem_to_hbm [thread:$0]  %s369_s4, 128, %s682_s6, [#allocation3]   ;;  %v477_v61 = vpop.f32.mrf.mxu0 }
 0x2de   :  { %530 = dma.done.wait [#allocation3], 128  }
 0x2df   :  { %531 = vsyncadd [#allocation3], 4294967168 }
 0x2e0   :  { %375 = vsyncpa [#allocation3], 1 }

</bundles_post_ra>
